<compile_context>
chip_gen: v6e
topology: v6e:2x2x1
jax: 0.10.0
libtpu: 0.0.40
codegen_flags: <defaults>
</compile_context>

<pallas_src>
import functools
import math

import jax
import jax.numpy as jnp
from jax.experimental import pallas as pl
from jax.experimental.pallas import tpu as pltpu

NUM_GROUPS = 32
EPS = 1e-6

_TILE_CANDIDATES = (2048, 1024, 512, 256, 128, 64, 32, 16, 8)


def _vmem_limit_bytes():
    """Generation-aware scoped-VMEM limit, leaving headroom for Mosaic scratch."""
    cap = 64 * 1024 * 1024  # conservative fallback (v7x-sized VMEM)
    try:
        cap = int(pltpu.get_tpu_info().vmem_capacity_bytes)
    except Exception:
        pass
    return min((cap * 3) // 4, 96 * 1024 * 1024)


def _divisor_tiles(n):
    tiles = [t for t in _TILE_CANDIDATES if t <= n and n % t == 0]
    if n not in tiles:
        tiles.append(n)
    return tiles


# -------------------- VMEM budget models (bytes, incl. double buffers) -----
def _kernel1_fits(tr, C, limit):
    tiles = 2 * (4 * tr * C) + 2 * (3 * 2 * tr * C)          # x in, q/k/v out
    wgt = 2 * (2 * C * 3 * C + 4 * 3 * C)                    # fused (C,3C) weight
    work = 4 * tr * 3 * C + 6 * tr * C                       # fp32 matmul result etc.
    return tiles + wgt + work <= int(limit * 0.8)


def _resident_fits(HW, C, tq, tk, limit):
    kv = 2 * 2 * (2 * HW * C)                                # K, V bf16, dbl-buffered
    xqo = 2 * (4 * tq * C + 2 * tq * C + 4 * tq * C)         # x, q, out tiles
    wgt = 2 * (2 * C * C + 4 * C)
    work = 16 * tq * tk + 16 * tq * C                        # scores/probs + acc temps
    return kv + xqo + wgt + work <= int(limit * 0.8)


def _streaming_fits(HW, C, tq, tk, limit):
    tiles = 2 * (4 * tq * C + 2 * tq * C + 4 * tq * C + 2 * (2 * tk * C))
    wgt = 2 * (2 * C * C + 4 * C)
    scr = 4 * tq * C + 8 * tq
    work = 16 * tq * tk + 8 * tq * C
    return tiles + wgt + scr + work <= int(limit * 0.8)


# ---------------------------------------------------------------------------
# Kernel 1: apply GroupNorm (precomputed per-(batch,channel) scale/shift) and
# one fused (C, 3C) QKV projection on a tile of rows.  q is pre-scaled by
# C**-0.5 because the scale is folded into wq/bq at trace time.
# ---------------------------------------------------------------------------
def _norm_qkv_kernel(x_ref, scale_ref, shift_ref, w_ref, b_ref,
                     q_ref, k_ref, v_ref):
    C = x_ref.shape[-1]
    x = x_ref[0]                                              # (tr, C) f32
    h = (x * scale_ref[0] + shift_ref[0]).astype(jnp.bfloat16)
    qkv = (jnp.dot(h, w_ref[...], preferred_element_type=jnp.float32)
           + b_ref[...]).astype(jnp.bfloat16)                 # (tr, 3C)
    q_ref[0] = qkv[:, :C]
    k_ref[0] = qkv[:, C:2 * C]
    v_ref[0] = qkv[:, 2 * C:]


# ---------------------------------------------------------------------------
# Kernel 2a (fast path): K/V for the whole batch row are VMEM-resident; the
# kernel loops over tk-slices with an online softmax carried as loop values.
# Grid (B, HW//tq), both axes "parallel".
# ---------------------------------------------------------------------------
def _attn_resident_kernel(x_ref, q_ref, k_ref, v_ref, wp_ref, bp_ref, o_ref,
                          *, tk, nk):
    q = q_ref[0]                                              # (tq, C) bf16
    tq, C = q.shape

    def body(j, carry):
        m_prev, l_prev, acc_prev = carry
        off = pl.multiple_of(j * tk, tk)
        k = k_ref[pl.ds(off, tk), :]                          # (tk, C) bf16, resident
        v = v_ref[pl.ds(off, tk), :]
        # Contract over channel dims of both operands (no k.T materialized).
        s = jax.lax.dot_general(q, k, (((1,), (1,)), ((), ())),
                                preferred_element_type=jnp.float32)   # (tq, tk)
        m_new = jnp.maximum(m_prev, jnp.max(s, axis=-1, keepdims=True))
        alpha = jnp.exp(m_prev - m_new)                       # fp32 softmax stats
        p = jnp.exp(s - m_new)
        l_new = alpha * l_prev + jnp.sum(p, axis=-1, keepdims=True)
        acc_new = alpha * acc_prev + jnp.dot(
            p.astype(jnp.bfloat16), v, preferred_element_type=jnp.float32)
        return m_new, l_new, acc_new

    m0 = jnp.full((tq, 1), -jnp.inf, dtype=jnp.float32)
    l0 = jnp.zeros((tq, 1), dtype=jnp.float32)
    a0 = jnp.zeros((tq, C), dtype=jnp.float32)
    _, l, acc = jax.lax.fori_loop(0, nk, body, (m0, l0, a0))

    inv_l = pl.reciprocal(l, approx=True)                     # deferred normalization
    attn = (acc * inv_l).astype(jnp.bfloat16)                 # (tq, C)
    proj = jnp.dot(attn, wp_ref[...],
                   preferred_element_type=jnp.float32) + bp_ref[...]
    o_ref[0] = x_ref[0] + proj                                # residual, f32


# ---------------------------------------------------------------------------
# Kernel 2b (fallback): streaming flash attention, grid (B, nq, nk) with the
# K reduction innermost ("arbitrary") and online softmax in VMEM scratch.
# ---------------------------------------------------------------------------
def _flash_attn_kernel(x_ref, q_ref, k_ref, v_ref, wp_ref, bp_ref, o_ref,
                       m_sc, l_sc, acc_sc):
    ki = pl.program_id(2)

    @pl.when(ki == 0)
    def _():
        m_sc[...] = jnp.full(m_sc.shape, -jnp.inf, dtype=m_sc.dtype)
        l_sc[...] = jnp.zeros(l_sc.shape, dtype=l_sc.dtype)
        acc_sc[...] = jnp.zeros(acc_sc.shape, dtype=acc_sc.dtype)

    q = q_ref[0]                                              # (tq, C) bf16
    k = k_ref[0]                                              # (tk, C) bf16
    v = v_ref[0]                                              # (tk, C) bf16

    s = jax.lax.dot_general(q, k, (((1,), (1,)), ((), ())),
                            preferred_element_type=jnp.float32)   # (tq, tk) f32

    m_prev = m_sc[...]
    m_new = jnp.maximum(m_prev, jnp.max(s, axis=-1, keepdims=True))
    alpha = jnp.exp(m_prev - m_new)
    p = jnp.exp(s - m_new)
    l_sc[...] = alpha * l_sc[...] + jnp.sum(p, axis=-1, keepdims=True)
    acc_sc[...] = alpha * acc_sc[...] + jnp.dot(
        p.astype(jnp.bfloat16), v, preferred_element_type=jnp.float32)
    m_sc[...] = m_new

    @pl.when(ki == pl.num_programs(2) - 1)
    def _():
        inv_l = pl.reciprocal(l_sc[...], approx=True)
        attn = (acc_sc[...] * inv_l).astype(jnp.bfloat16)
        proj = jnp.dot(attn, wp_ref[...],
                       preferred_element_type=jnp.float32) + bp_ref[...]
        o_ref[0] = x_ref[0] + proj


def attn_block_pallas(x_nchw, params, *, tq=None, tk=None, tr=None, mode="auto"):
    """x_nchw: (B, C, H, W) float32.  Returns (B, C, H, W) float32."""
    assert mode in ("auto", "resident", "streaming")
    B, C, H, W = x_nchw.shape
    assert C % NUM_GROUPS == 0, "GroupNorm(32) requires C % 32 == 0"
    HW = H * W
    cs = C // NUM_GROUPS
    limit = _vmem_limit_bytes()

    x_nchw = x_nchw.astype(jnp.float32)

    # GroupNorm statistics: single fused pass (mean + mean-of-squares) over the
    # contiguous (cs, H, W) axes of the NCHW input, before the relayout.  The
    # full-HW reduction must precede any tile-wise normalization, so the tiny
    # per-(batch, channel) scale/shift are precomputed here and applied in
    # kernel 1.
    xg = x_nchw.reshape(B, NUM_GROUPS, cs, H, W)
    mean_g = jnp.mean(xg, axis=(2, 3, 4))                      # (B, G)
    meansq_g = jnp.mean(jnp.square(xg), axis=(2, 3, 4))        # (B, G)
    var_g = jnp.maximum(meansq_g - jnp.square(mean_g), 0.0)
    inv_g = jax.lax.rsqrt(var_g + jnp.float32(EPS))            # (B, G)
    gamma_gc = params["gamma"].astype(jnp.float32).reshape(NUM_GROUPS, cs)
    scale_c = (gamma_gc[None] * inv_g[:, :, None]).reshape(B, 1, C)
    shift_c = (params["beta"].astype(jnp.float32)[None, :]
               - (gamma_gc[None] * (mean_g * inv_g)[:, :, None]).reshape(B, C)
               ).reshape(B, 1, C)

    # NCHW -> (B, HW, C): lane-dense channels, spatial positions on sublanes.
    x = jnp.transpose(x_nchw, (0, 2, 3, 1)).reshape(B, HW, C)

    # 1x1-conv weights: (Cout, Cin) -> (Cin, Cout) bf16.  QKV fused to (C, 3C);
    # the C**-0.5 attention scale is folded into wq / bq once at trace time.
    qs = jnp.float32(float(C) ** (-0.5))
    w_qkv = jnp.concatenate(
        [params["wq"].T * qs, params["wk"].T, params["wv"].T],
        axis=1).astype(jnp.bfloat16)                           # (C, 3C)
    b_qkv = jnp.concatenate(
        [params["bq"] * qs, params["bk"], params["bv"]]
    ).reshape(1, 3 * C).astype(jnp.float32)
    wp = params["wp"].T.astype(jnp.bfloat16)
    bp = params["bp"].reshape(1, C).astype(jnp.float32)

    # ---- Kernel 1: GroupNorm apply + fused QKV projection -------------------
    if tr is None:
        tr = next((t for t in _divisor_tiles(HW) if _kernel1_fits(t, C, limit)),
                  _divisor_tiles(HW)[-1])
    q, k, v = pl.pallas_call(
        _norm_qkv_kernel,
        out_shape=[jax.ShapeDtypeStruct((B, HW, C), jnp.bfloat16)] * 3,
        grid=(B, HW // tr),
        in_specs=[
            pl.BlockSpec((1, tr, C), lambda b, r: (b, r, 0)),       # x
            pl.BlockSpec((1, 1, C), lambda b, r: (b, 0, 0)),        # scale
            pl.BlockSpec((1, 1, C), lambda b, r: (b, 0, 0)),        # shift
            pl.BlockSpec((C, 3 * C), lambda b, r: (0, 0)),          # fused w_qkv
            pl.BlockSpec((1, 3 * C), lambda b, r: (0, 0)),          # fused b_qkv
        ],
        out_specs=[pl.BlockSpec((1, tr, C), lambda b, r: (b, r, 0))] * 3,
        compiler_params=pltpu.CompilerParams(
            dimension_semantics=("parallel", "parallel"),
            vmem_limit_bytes=limit),
    )(x, scale_c, shift_c, w_qkv, b_qkv)

    # ---- Kernel 2: attention + output projection + residual -----------------
    tiles = _divisor_tiles(HW)
    use_resident = False
    tq_r = tk_r = None
    if mode in ("auto", "resident"):
        for cq in ([tq] if tq is not None else tiles):
            for ck in ([tk] if tk is not None else tiles):
                if _resident_fits(HW, C, cq, ck, limit):
                    tq_r, tk_r, use_resident = cq, ck, True
                    break
            if use_resident:
                break
        if mode == "resident" and not use_resident:
            raise ValueError("resident K/V does not fit the VMEM budget")

    if use_resident:
        nk = HW // tk_r
        out = pl.pallas_call(
            functools.partial(_attn_resident_kernel, tk=tk_r, nk=nk),
            out_shape=jax.ShapeDtypeStruct((B, HW, C), jnp.float32),
            grid=(B, HW // tq_r),
            in_specs=[
                pl.BlockSpec((1, tq_r, C), lambda b, i: (b, i, 0)),   # x (residual)
                pl.BlockSpec((1, tq_r, C), lambda b, i: (b, i, 0)),   # q
                pl.BlockSpec((None, HW, C), lambda b, i: (b, 0, 0)),  # K resident
                pl.BlockSpec((None, HW, C), lambda b, i: (b, 0, 0)),  # V resident
                pl.BlockSpec((C, C), lambda b, i: (0, 0)),            # wp
                pl.BlockSpec((1, C), lambda b, i: (0, 0)),            # bp
            ],
            out_specs=pl.BlockSpec((1, tq_r, C), lambda b, i: (b, i, 0)),
            compiler_params=pltpu.CompilerParams(
                dimension_semantics=("parallel", "parallel"),
                vmem_limit_bytes=limit),
        )(x, q, k, v, wp, bp)
    else:
        tq_s, tk_s = tq, tk
        if tq_s is None or tk_s is None:
            found = False
            for cq in ([tq] if tq is not None else tiles):
                for ck in ([tk] if tk is not None else tiles):
                    if _streaming_fits(HW, C, cq, ck, limit):
                        tq_s, tk_s, found = cq, ck, True
                        break
                if found:
                    break
            if not found:
                tq_s, tk_s = tiles[-1], tiles[-1]
        out = pl.pallas_call(
            _flash_attn_kernel,
            out_shape=jax.ShapeDtypeStruct((B, HW, C), jnp.float32),
            grid=(B, HW // tq_s, HW // tk_s),
            in_specs=[
                pl.BlockSpec((1, tq_s, C), lambda b, i, j: (b, i, 0)),  # x
                pl.BlockSpec((1, tq_s, C), lambda b, i, j: (b, i, 0)),  # q
                pl.BlockSpec((1, tk_s, C), lambda b, i, j: (b, j, 0)),  # k
                pl.BlockSpec((1, tk_s, C), lambda b, i, j: (b, j, 0)),  # v
                pl.BlockSpec((C, C), lambda b, i, j: (0, 0)),           # wp
                pl.BlockSpec((1, C), lambda b, i, j: (0, 0)),           # bp
            ],
            out_specs=pl.BlockSpec((1, tq_s, C), lambda b, i, j: (b, i, 0)),
            scratch_shapes=[
                pltpu.VMEM((tq_s, 1), jnp.float32),   # running max
                pltpu.VMEM((tq_s, 1), jnp.float32),   # running sum
                pltpu.VMEM((tq_s, C), jnp.float32),   # output accumulator
            ],
            compiler_params=pltpu.CompilerParams(
                dimension_semantics=("parallel", "parallel", "arbitrary"),
                vmem_limit_bytes=limit),
        )(x, q, k, v, wp, bp)

    # (B, HW, C) -> NCHW
    return jnp.transpose(out.reshape(B, H, W, C), (0, 3, 1, 2))


def attn_block_reference(x_nchw, params):
    """Pure-JAX fp32 reference mirroring the PyTorch forward (NCHW)."""
    B, C, H, W = x_nchw.shape
    cs = C // NUM_GROUPS
    xg = x_nchw.reshape(B, NUM_GROUPS, cs * H * W)
    mean = jnp.mean(xg, axis=-1, keepdims=True)
    var = jnp.var(xg, axis=-1, keepdims=True)
    hn = ((xg - mean) / jnp.sqrt(var + EPS)).reshape(B, C, H, W)
    hn = hn * params["gamma"][None, :, None, None] + params["beta"][None, :, None, None]
    conv1x1 = lambda t, w, b: (jnp.einsum("oi,bihw->bohw", w, t)
                               + b[None, :, None, None])
    q = conv1x1(hn, params["wq"], params["bq"])
    k = conv1x1(hn, params["wk"], params["bk"])
    v = conv1x1(hn, params["wv"], params["bv"])
    q = q.reshape(B, C, H * W).transpose(0, 2, 1)       # (B, HW, C)
    k = k.reshape(B, C, H * W)                          # (B, C, HW)
    w_ = jnp.einsum("bqc,bck->bqk", q, k) * (float(C) ** (-0.5))
    w_ = jax.nn.softmax(w_, axis=2)
    v = v.reshape(B, C, H * W)
    h_ = jnp.einsum("bck,bqk->bcq", v, w_).reshape(B, C, H, W)
    h_ = conv1x1(h_, params["wp"], params["bp"])
    return x_nchw + h_


def _init_params(key, C):
    ks = jax.random.split(key, 8)
    scale = 1.0 / math.sqrt(C)
    return {
        "gamma": 1.0 + 0.05 * jax.random.normal(ks[0], (C,), jnp.float32),
        "beta": 0.05 * jax.random.normal(ks[1], (C,), jnp.float32),
        "wq": scale * jax.random.normal(ks[2], (C, C), jnp.float32),
        "bq": 0.01 * jax.random.normal(ks[3], (C,), jnp.float32),
        "wk": scale * jax.random.normal(ks[4], (C, C), jnp.float32),
        "bk": 0.01 * jax.random.normal(ks[5], (C,), jnp.float32),
        "wv": scale * jax.random.normal(ks[6], (C, C), jnp.float32),
        "bv": 0.01 * jax.random.normal(ks[7], (C,), jnp.float32),
        "wp": scale * jax.random.normal(jax.random.fold_in(key, 100), (C, C), jnp.float32),
        "bp": 0.01 * jax.random.normal(jax.random.fold_in(key, 101), (C,), jnp.float32),
    }


if __name__ == "__main__":
    # Small shapes consistent with the module (GroupNorm(32) needs C % 32 == 0).
    # C=128 keeps every tile lane-exact; tk=128 over HW=256 exercises the
    # online-softmax accumulation across two K/V slices in both code paths.
    B, C, H, W = 2, 128, 16, 16
    key = jax.random.PRNGKey(0)
    kx, kp = jax.random.split(key)
    x = jax.random.normal(kx, (B, C, H, W), jnp.float32)
    params = _init_params(kp, C)

    ref = attn_block_reference(x, params)

    # Fast path: VMEM-resident K/V, fori_loop online softmax inside the kernel.
    out_res = attn_block_pallas(x, params, tq=128, tk=128, tr=128, mode="resident")
    out_res = jax.block_until_ready(out_res)
    assert out_res.shape == (B, C, H, W)
    assert jnp.allclose(out_res, ref, atol=5e-2, rtol=5e-2), \
        float(jnp.max(jnp.abs(out_res - ref)))

    # Fallback path: streaming K/V tiles with the grid reduction axis.
    out_str = attn_block_pallas(x, params, tq=128, tk=128, tr=128, mode="streaming")
    out_str = jax.block_until_ready(out_str)
    assert jnp.allclose(out_str, ref, atol=5e-2, rtol=5e-2), \
        float(jnp.max(jnp.abs(out_str - ref)))

    print("KERNEL_OK")
</pallas_src>

<mosaic_0001>
module attributes {stable_mosaic.version = 11 : i64} {
  func.func @_norm_qkv_kernel(%arg0: i32, %arg1: i32, %arg2: memref<1x128x128xf32, #tpu.memory_space<vmem>>, %arg3: memref<1x1x128xf32, #tpu.memory_space<vmem>>, %arg4: memref<1x1x128xf32, #tpu.memory_space<vmem>>, %arg5: memref<128x384xbf16, #tpu.memory_space<vmem>>, %arg6: memref<1x384xf32, #tpu.memory_space<vmem>>, %arg7: memref<1x128x128xbf16, #tpu.memory_space<vmem>>, %arg8: memref<1x128x128xbf16, #tpu.memory_space<vmem>>, %arg9: memref<1x128x128xbf16, #tpu.memory_space<vmem>>) attributes {dimension_semantics = [#tpu.dimension_semantics<parallel>, #tpu.dimension_semantics<parallel>], iteration_bounds = array<i64: 2, 2>, scalar_prefetch = 0 : i64, scratch_operands = 0 : i64, tpu.core_type = #tpu.core_type<tc>, window_params = [{transform_indices = @transform_0, window_bounds = array<i64: 1, 128, 128>}, {transform_indices = @transform_1, window_bounds = array<i64: 1, 1, 128>}, {transform_indices = @transform_2, window_bounds = array<i64: 1, 1, 128>}, {pipeline_mode = #tpu.pipeline_mode<synchronous>, transform_indices = @transform_3, window_bounds = array<i64: 128, 384>}, {pipeline_mode = #tpu.pipeline_mode<synchronous>, transform_indices = @transform_4, window_bounds = array<i64: 1, 384>}, {transform_indices = @transform_5, window_bounds = array<i64: 1, 128, 128>}, {transform_indices = @transform_6, window_bounds = array<i64: 1, 128, 128>}, {transform_indices = @transform_7, window_bounds = array<i64: 1, 128, 128>}]} {
    %c0 = arith.constant 0 : index
    %c0_0 = arith.constant 0 : index
    %c0_1 = arith.constant 0 : index
    %0 = vector.load %arg2[%c0, %c0_0, %c0_1] : memref<1x128x128xf32, #tpu.memory_space<vmem>>, vector<1x128x128xf32>
    %1 = vector.shape_cast %0 : vector<1x128x128xf32> to vector<128x128xf32>
    %c0_2 = arith.constant 0 : index
    %c0_3 = arith.constant 0 : index
    %c0_4 = arith.constant 0 : index
    %2 = vector.load %arg3[%c0_2, %c0_3, %c0_4] : memref<1x1x128xf32, #tpu.memory_space<vmem>>, vector<1x1x128xf32>
    %3 = vector.shape_cast %2 : vector<1x1x128xf32> to vector<1x128xf32>
    %4 = vector.broadcast %3 : vector<1x128xf32> to vector<128x128xf32>
    %5 = arith.mulf %1, %4 : vector<128x128xf32>
    %c0_5 = arith.constant 0 : index
    %c0_6 = arith.constant 0 : index
    %c0_7 = arith.constant 0 : index
    %6 = vector.load %arg4[%c0_5, %c0_6, %c0_7] : memref<1x1x128xf32, #tpu.memory_space<vmem>>, vector<1x1x128xf32>
    %7 = vector.shape_cast %6 : vector<1x1x128xf32> to vector<1x128xf32>
    %8 = vector.broadcast %7 : vector<1x128xf32> to vector<128x128xf32>
    %9 = arith.addf %5, %8 : vector<128x128xf32>
    %10 = arith.truncf %9 : vector<128x128xf32> to vector<128x128xbf16>
    %c0_8 = arith.constant 0 : index
    %c0_9 = arith.constant 0 : index
    %11 = vector.load %arg5[%c0_8, %c0_9] : memref<128x384xbf16, #tpu.memory_space<vmem>>, vector<128x384xbf16>
    %cst = arith.constant dense<0.000000e+00> : vector<128x384xf32>
    %12 = tpu.matmul %10, %11, %cst {dimension_numbers = #tpu.dot_dimension_numbers<[1], [0], [0], [1], [0, 0, 1, 1], [], []>} : vector<128x128xbf16>, vector<128x384xbf16>, vector<128x384xf32> -> vector<128x384xf32>
    %c0_10 = arith.constant 0 : index
    %c0_11 = arith.constant 0 : index
    %13 = vector.load %arg6[%c0_10, %c0_11] : memref<1x384xf32, #tpu.memory_space<vmem>>, vector<1x384xf32>
    %14 = vector.broadcast %13 : vector<1x384xf32> to vector<128x384xf32>
    %15 = arith.addf %12, %14 : vector<128x384xf32>
    %16 = arith.truncf %15 : vector<128x384xf32> to vector<128x384xbf16>
    %17 = vector.extract_strided_slice %16 {offsets = [0, 0], sizes = [128, 128], strides = [1, 1]} : vector<128x384xbf16> to vector<128x128xbf16>
    %c0_12 = arith.constant 0 : index
    %c0_13 = arith.constant 0 : index
    %c0_14 = arith.constant 0 : index
    %18 = vector.load %arg7[%c0_12, %c0_13, %c0_14] : memref<1x128x128xbf16, #tpu.memory_space<vmem>>, vector<1x128x128xbf16>
    %19 = vector.shape_cast %18 : vector<1x128x128xbf16> to vector<128x128xbf16>
    %20 = vector.shape_cast %17 : vector<128x128xbf16> to vector<1x128x128xbf16>
    tpu.vector_store %arg7[%c0_12, %c0_13, %c0_14], %20 {strides = array<i32>} : memref<1x128x128xbf16, #tpu.memory_space<vmem>>, vector<1x128x128xbf16>,
    %21 = vector.extract_strided_slice %16 {offsets = [0, 128], sizes = [128, 128], strides = [1, 1]} : vector<128x384xbf16> to vector<128x128xbf16>
    %c0_15 = arith.constant 0 : index
    %c0_16 = arith.constant 0 : index
    %c0_17 = arith.constant 0 : index
    %22 = vector.load %arg8[%c0_15, %c0_16, %c0_17] : memref<1x128x128xbf16, #tpu.memory_space<vmem>>, vector<1x128x128xbf16>
    %23 = vector.shape_cast %22 : vector<1x128x128xbf16> to vector<128x128xbf16>
    %24 = vector.shape_cast %21 : vector<128x128xbf16> to vector<1x128x128xbf16>
    tpu.vector_store %arg8[%c0_15, %c0_16, %c0_17], %24 {strides = array<i32>} : memref<1x128x128xbf16, #tpu.memory_space<vmem>>, vector<1x128x128xbf16>,
    %25 = vector.extract_strided_slice %16 {offsets = [0, 256], sizes = [128, 128], strides = [1, 1]} : vector<128x384xbf16> to vector<128x128xbf16>
    %c0_18 = arith.constant 0 : index
    %c0_19 = arith.constant 0 : index
    %c0_20 = arith.constant 0 : index
    %26 = vector.load %arg9[%c0_18, %c0_19, %c0_20] : memref<1x128x128xbf16, #tpu.memory_space<vmem>>, vector<1x128x128xbf16>
    %27 = vector.shape_cast %26 : vector<1x128x128xbf16> to vector<128x128xbf16>
    %28 = vector.shape_cast %25 : vector<128x128xbf16> to vector<1x128x128xbf16>
    tpu.vector_store %arg9[%c0_18, %c0_19, %c0_20], %28 {strides = array<i32>} : memref<1x128x128xbf16, #tpu.memory_space<vmem>>, vector<1x128x128xbf16>,
    return
  }
  func.func @transform_0(%arg0: i32, %arg1: i32) -> (i32, i32, i32) {
    %c0_i32 = arith.constant 0 : i32
    %c0_i32_0 = arith.constant 0 : i32
    return %arg0, %arg1, %c0_i32 : i32, i32, i32
  }
  func.func @transform_1(%arg0: i32, %arg1: i32) -> (i32, i32, i32) {
    %c0_i32 = arith.constant 0 : i32
    %c0_i32_0 = arith.constant 0 : i32
    %c0_i32_1 = arith.constant 0 : i32
    return %arg0, %c0_i32, %c0_i32_0 : i32, i32, i32
  }
  func.func @transform_2(%arg0: i32, %arg1: i32) -> (i32, i32, i32) {
    %c0_i32 = arith.constant 0 : i32
    %c0_i32_0 = arith.constant 0 : i32
    %c0_i32_1 = arith.constant 0 : i32
    return %arg0, %c0_i32, %c0_i32_0 : i32, i32, i32
  }
  func.func @transform_3(%arg0: i32, %arg1: i32) -> (i32, i32) {
    %c0_i32 = arith.constant 0 : i32
    %c0_i32_0 = arith.constant 0 : i32
    %c0_i32_1 = arith.constant 0 : i32
    return %c0_i32, %c0_i32_0 : i32, i32
  }
  func.func @transform_4(%arg0: i32, %arg1: i32) -> (i32, i32) {
    %c0_i32 = arith.constant 0 : i32
    %c0_i32_0 = arith.constant 0 : i32
    %c0_i32_1 = arith.constant 0 : i32
    return %c0_i32, %c0_i32_0 : i32, i32
  }
  func.func @transform_5(%arg0: i32, %arg1: i32) -> (i32, i32, i32) {
    %c0_i32 = arith.constant 0 : i32
    %c0_i32_0 = arith.constant 0 : i32
    return %arg0, %arg1, %c0_i32 : i32, i32, i32
  }
  func.func @transform_6(%arg0: i32, %arg1: i32) -> (i32, i32, i32) {
    %c0_i32 = arith.constant 0 : i32
    %c0_i32_0 = arith.constant 0 : i32
    return %arg0, %arg1, %c0_i32 : i32, i32, i32
  }
  func.func @transform_7(%arg0: i32, %arg1: i32) -> (i32, i32, i32) {
    %c0_i32 = arith.constant 0 : i32
    %c0_i32_0 = arith.constant 0 : i32
    return %arg0, %arg1, %c0_i32 : i32, i32, i32
  }
}

</mosaic_0001>

<bundles_post_ra>
// kernel: tpu_custom_call.1
= control target key start
LH: loop header
LB: loop body
LE: loop exit
PB: predicated region body
PF: predicated region fallthrough
CT: control target
= control target key end

     0   :  { %s2691_s0 = inlined_call_operand.hbm [shape: f32[2,256,128], index: 0, kind: input, shape index: {}]   ;;  %s2692_s1 = inlined_call_operand.hbm [shape: f32[2,1,128], index: 1, kind: input, shape index: {}]   ;;  %s2693_s2 = inlined_call_operand.vmem [shape: f32[2,1,128], index: 2, kind: input, shape index: {}]   ;;  %s2694_s3 = inlined_call_operand.hbm [shape: bf16[128,384], index: 3, kind: input, shape index: {}]   ;;  %s2695_s4 = inlined_call_operand.vmem [shape: f32[1,384], index: 4, kind: input, shape index: {}]   ;;  %s2696_s5 = inlined_call_operand.hbm [shape: bf16[2,256,128], index: 5, kind: output, shape index: {0}]   ;;  %s2697_s6 = inlined_call_operand.hbm [shape: bf16[2,256,128], index: 6, kind: output, shape index: {1}]   ;;  %s2698_s7 = inlined_call_operand.hbm [shape: bf16[2,256,128], index: 7, kind: output, shape index: {2}]  }
   0x1   :  { %2715 = sst [smem:[#allocation25_spill]] %s2691_s0 }
   0x2   :  { %2716 = sst [smem:[#allocation26_spill]] %s2692_s1 }
   0x3   :  { %2717 = sst [smem:[#allocation27_spill]] %s2693_s2 }
   0x4   :  { %2718 = sst [smem:[#allocation28_spill]] %s2694_s3 }
   0x5   :  { %2719 = sst [smem:[#allocation29_spill]] %s2695_s4 }
   0x6   :  { %2720 = sst [smem:[#allocation30_spill]] %s2696_s5 }
   0x7   :  { %2721 = sst [smem:[#allocation31_spill]] %s2697_s6 }
   0x8   :  { %2722 = sst [smem:[#allocation32_spill]] %s2698_s7 }
   0x9   :  { %13 = vsyncpa [#allocation3], 0 }
   0xa   :  { %15 = vsyncpa [#allocation3 + $0x1], 0 }
   0xb   :  { %16 = vsyncpa [#allocation6], 0 }
   0xc   :  { %18 = vsyncpa [#allocation6 + $0x1], 0 }
   0xd   :  { %19 = vsyncpa [#allocation4], 0 }
   0xe   :  { %21 = vsyncpa [#allocation4 + $0x1], 0 }
   0xf   :  { %22 = vsyncpa [#allocation10], 0 }
  0x10   :  { %24 = vsyncpa [#allocation10 + $0x1], 0  ;;  %s2187_s24 = smov 0   ;;  %s2189_s25 = smov 0  }
  0x11   :  { %s2191_s26 = smov 0   ;;  %s2193_s27 = smov 0  }
  0x12   :  { %s2195_s28 = smov 0   ;;  %s2197_s29 = smov 0  }
  0x13   :  { %s2199_s30 = smov 0   ;;  %s2201_s8 = smov 0  }
  0x14   :  { %s2203_s9 = smov 0   ;;  %s2205_s10 = smov 0  }
  0x15   :  { %s2207_s11 = smov 0  }
  0x16 LB: > { %2723 = sst [smem:[#allocation17_spill]] %s2104_s27  ;;  %s2243_s12 = sadd.s32 4294967295, %s2132_s11   ;;  %s2132_s11 = sphi %s2207_s11, %s30_s11   ;;  %s2128_s10 = sphi %s2205_s10, %s2765_s10   ;;  %s2124_s9 = sphi %s2203_s9, %s2764_s9   ;;  %s2120_s8 = sphi %s2201_s8, %s2763_s8   ;;  %s2116_s30 = sphi %s2199_s30, %s2762_s30   ;;  %s2112_s29 = sphi %s2197_s29, %s2771_s29   ;;  %s2108_s28 = sphi %s2195_s28, %s2770_s28   ;;  %s2104_s27 = sphi %s2193_s27, %s2769_s27   ;;  %s2100_s26 = sphi %s2191_s26, %s2768_s26   ;;  %s2096_s25 = sphi %s2189_s25, %s2767_s25   ;;  %s2092_s24 = sphi %s2187_s24, %s2766_s24  }
  0x17   : > { %2724 = sst [smem:[#allocation18_spill]] %s2116_s30  ;;  %s2699_s13 = sadd.s32 4294967294, %s2132_s11  }
  0x18   : > { %2725 = sst [smem:[#allocation19_spill]] %s2124_s9  ;;  %p64_p0 = scmp.ne.s32.totalorder %s2108_s28, %s2104_s27 }
  0x19   : > { %2726 = sst [smem:[#allocation20_spill]] %s2128_s10  ;;  %p2710_p1 = scmp.eq.s32.totalorder %s2243_s12, 0 }
  0x1a   : > { %p190_p3 = scmp.eq.s32.totalorder %s2699_s13, 3  ;;  %p1360_p5 = scmp.ge.s32.totalorder %s2132_s11, 1 }
  0x1b   : > { %p2254_p4 = por %p2710_p1, %p64_p0  ;;  %p253_p7 = scmp.lt.s32.totalorder %s2132_s11, 5 }
  0x1c   : > { %p2259_p6 = por %p190_p3, %p64_p0  ;;  %s2134_s17 = smov [#allocation7]  }
  0x1d   : > { %p2264_p8 = pnand %p1360_p5, %p253_p7  ;;  %s265_s18 = sshll.u32 %s2134_s17, 4  ;;  %s266_s18 = int_to_ptr.vmem [resolvable:$true] %s265_s18 }
  0x1e   : > { %s2728_s15 = scalar_select %p2259_p6, 1, 0 }
  0x1f   : > { %p1713_p9 = pneg %p2264_p8  ;;  %s1877_s19 = scalar_lea.vmem %s266_s18, 3072 }
  0x20   : > { %2729 = sst [smem:[#allocation21_spill]] %s2728_s15  ;;  %p1878_p12 = scmp.ne.s32.totalorder %s266_s18, %s1877_s19 }
  0x21   : > { %p1714_p10 = pnand %p1713_p9, %p2710_p1  ;;  %p1885_p3 = scmp.lt.s32.totalorder %s266_s18, %s266_s18 }
  0x22   : > { %p1886_p2 = scmp.lt.s32.totalorder %s1877_s19, %s1877_s19 }
  0x23   : > { %p1868_p11 = pneg %p1714_p10 }
  0x24   : > { %p1887_p6 = por %p1886_p2, %p1885_p3 }
  0x25   : > { %p1880_p13 = pnand %p1878_p12, %p1868_p11 }
  0x27   : > { %p1881_p0 = pneg %p1880_p13 }
  0x29   : > { %p1888_p5 = pnand %p1887_p6, %p1881_p0 }
  0x2b   : > { %1891 = shalt.err (!%p1888_p5)
}
  0x2c   : > { %s2135_s20 = smov 192   ;;  %s2136_s21 = smov 12  }
  0x2d   : > { %s2731_s3 = sld [smem:[#allocation28_spill]]  ;;  %s39_s17 = sadd.s32 1, %s2124_s9 }
  0x2e   : > { %p40_p2 = scmp.ge.s32.totalorder %s39_s17, 2  ;;  %s42_s19 = sadd.s32 1, %s2128_s10 }
  0x2f   : > { %s51_s13 = sadd.s32 1, %s2112_s29  ;;  %p58_p6 = scmp.ne.s32.totalorder %s2112_s29, %s2108_s28 }
  0x30   : > { %s2773_s17 = smov (%p40_p2, %s39_s17), 0  ;;  %s2775_s19 = smov (!%p40_p2, %s42_s19), %s2128_s10 }
  0x31   : > { %2732 = sst [smem:[#allocation22_spill]] %s2773_s17  ;;  %s47_s15 = ssub.s32 %s2124_s9, %s2773_s17 }
  0x32   : > { %p2711_p7 = scmp.eq.s32.totalorder %s2132_s11, 0  ;;  %p44_p9 = scmp.ge.s32.totalorder %s2775_s19, 2 }
  0x33   : > { %1716 = dma.hbm_to_vmem [thread:$0]  (!%p1714_p10), %s2731_s3, 3072, %s266_s18, [#allocation6], %s2135_s20, %s2135_s20, %s2136_s21  }
  0x34   : > { %p2733_p11 = scmp.eq.s32.totalorder %s2243_s12, 3  ;;  %p2294_p10 = por %p2711_p7, %p58_p6 }
  0x35   : > { %p1735_p13 = scmp.lt.s32.totalorder %s2132_s11, 4  ;;  %s2777_s19 = smov (%p44_p9, %s2775_s19), 0 }
  0x36   : > { %p2288_p12 = por %p2733_p11, %p58_p6  ;;  %2737 = sst [smem:[#allocation24_spill]] %s2777_s19 }
  0x37   : > { %s282_s20 = sand.u32 1, %s2112_s29   ;;  %s1364_s21 = sshll.u32 %s2124_s9, 4 }
  0x38   : > { %s2734_s22 = scalar_select %p2288_p12, 1, 0 }
  0x39   : > { %s2305_s23 = ssub.s32 %s2128_s10, %s2777_s19  ;;  %s1363_s17 = sshll.u32 %s282_s20, 7 }
  0x3a   : > { %2735 = sst [smem:[#allocation23_spill]] %s2734_s22  ;;  %s48_s3 = sor.u32 %s47_s15, %s2305_s23 }
  0x3b   : > { %p49_p3 = scmp.eq.s32.totalorder %s48_s3, 0  ;;  %s1365_s27 = sshll.u32 %s2128_s10, 5 }
  0x3c   : > { %s292_s6 = sadd.s32 %s1365_s27, %s1364_s21  ;;  %s286_s5 = scalar_lea.vmem [#allocation2], %s1363_s17 }
  0x3d   : > { %s2311_s7 = scalar_select %p49_p3, %s2112_s29, %s51_s13  }
  0x3e   : > { %s295_s22 = sshll.u32 %s286_s5, 4  ;;  %s1366_s30 = sshll.u32 %s292_s6, 7  ;;  %s296_s22 = int_to_ptr.vmem [resolvable:$true] %s295_s22 }
  0x3f   : > { %s2738_s0 = sld [smem:[#allocation25_spill]]  ;;  %p2320_p5 = pnand %p1735_p13, %p2294_p10 }
  0x40   : > { %s283_s3 = scalar_lea.sflag [#allocation3], %s282_s20  ;;  %s1905_s13 = scalar_lea.vmem %s296_s22, 2048 }
  0x41   : > { %p1894_p2 = pneg %p2320_p5  ;;  %p1906_p6 = scmp.ne.s32.totalorder %s296_s22, %s1905_s13 }
  0x42   : > { %s2137_s5 = smov [#allocation2]  }
  0x43   : > { %p1908_p9 = pnand %p1906_p6, %p1894_p2  ;;  %s1910_s6 = sshll.u32 %s2137_s5, 4  ;;  %s1911_s6 = int_to_ptr.vmem [resolvable:$false] %s1910_s6 }
  0x44   : > { %s1912_s27 = scalar_lea.vmem %s1911_s6, 4096  ;;  %p1913_p3 = scmp.lt.s32.totalorder %s296_s22, %s1911_s6 }
  0x45   : > { %s294_s9 = scalar_lea.hbm %s2738_s0, %s1366_s30  ;;  %p1909_p11 = pneg %p1908_p9 }
  0x46   : > { %p1914_p1 = scmp.lt.s32.totalorder %s1912_s27, %s1905_s13 }
  0x48   : > { %p1915_p7 = por %p1914_p1, %p1913_p3 }
  0x4a   : > { %p1916_p0 = pnand %p1915_p7, %p1909_p11 }
  0x4c   : > { %1919 = shalt.err (!%p1916_p0)
}
  0x4d   : > { %s2138_s2 = smov 128   ;;  %s2139_s4 = smov 8  }
  0x4e   : > { %1720 = dma.hbm_to_vmem [thread:$0]  (!%p2320_p5), %s294_s9, 2048, %s296_s22, %s283_s3, %s2138_s2, %s2138_s2, %s2139_s4  }
  0x4f   : > { %s77_s30 = sadd.s32 1, %s2100_s26  ;;  %p2740_p1 = scmp.eq.s32.totalorder %s2305_s23, 0 }
  0x50   : > { %p84_p7 = scmp.ne.s32.totalorder %s2100_s26, %s2096_s25  ;;  %p90_p10 = scmp.ne.s32.totalorder %s2096_s25, %s2092_s24 }
  0x51   : > { %s2332_s15 = scalar_select %p2740_p1, %s2100_s26, %s77_s30  }
  0x52   : > { %s305_s17 = sand.u32 1, %s2132_s11   ;;  %s307_s18 = sand.u32 1, %s2100_s26  }
  0x53   : > { %p2741_p0 = scmp.eq.s32.totalorder %s2132_s11, 0  ;;  %p2742_p6 = scmp.eq.s32.totalorder %s2243_s12, 0 }
  0x54   : > { %s1367_s21 = sshll.u32 %s2128_s10, 4  ;;  %s308_s13 = scalar_lea.vmem [#allocation5], %s307_s18 }
  0x55   : > { %p86_p2 = por %p84_p7, %p2741_p0  ;;  %p2344_p9 = por %p90_p10, %p2742_p6 }
  0x56   : > { %s315_s5 = sshll.u32 %s308_s13, 4  ;;  %s2744_s1 = sld [smem:[#allocation26_spill]]  ;;  %s316_s5 = int_to_ptr.vmem [resolvable:$true] %s315_s5 }
  0x57   : > { %p2354_p5 = pnand %p1735_p13, %p86_p2  ;;  %s306_s23 = scalar_lea.sflag [#allocation6], %s305_s17 }
  0x58   : > { %s1933_s3 = scalar_lea.vmem %s316_s5, 16  ;;  %s2140_s6 = smov [#allocation5]  }
  0x59   : > { %p1922_p11 = pneg %p2354_p5  ;;  %p1934_p3 = scmp.ne.s32.totalorder %s316_s5, %s1933_s3 }
  0x5a   : > { %s1938_s27 = sshll.u32 %s2140_s6, 4  ;;  %s1939_s27 = int_to_ptr.vmem [resolvable:$false] %s1938_s27 }
  0x5b   : > { %p1936_p1 = pnand %p1934_p3, %p1922_p11  ;;  %s1940_s2 = scalar_lea.vmem %s1939_s27, 32 }
  0x5c   : > { %s313_s22 = scalar_lea.hbm %s2744_s1, %s1367_s21  ;;  %p1941_p10 = scmp.lt.s32.totalorder %s316_s5, %s1939_s27 }
  0x5d   : > { %p1937_p7 = pneg %p1936_p1  ;;  %p1942_p0 = scmp.lt.s32.totalorder %s1940_s2, %s1933_s3 }
  0x5f   : > { %p1943_p6 = por %p1942_p0, %p1941_p10 }
  0x61   : > { %p1944_p12 = pnand %p1943_p6, %p1937_p7 }
  0x63   : > { %1947 = shalt.err (!%p1944_p12)
}
  0x64   : > { %1723 = dma.hbm_to_vmem [thread:$0]  (!%p2354_p5), %s313_s22, 16, %s316_s5, %s306_s23  }
  0x65   : > { %330 = sbr.rel (%p2264_p8) target bundleno = 467 (0x1d3), region = 40  ;;  %s2365_s4 = sand.u32 (!%p2264_p8), 1, %s2108_s28  }
  0x66   : > { %s1369_s30 = sshll.u32 (!%p2264_p8), %s2365_s4, 7  ;;  %s333_s17 = scalar_lea.sflag (!%p2264_p8), [#allocation3], %s2365_s4 }
  0x67   : > { %s2369_s18 = scalar_lea.vmem (!%p2264_p8), [#allocation2], %s1369_s30 }
  0x6a   : > { %2071 = dma.done.wait (%p2254_p4), %s333_s17, 2048  }
  0x6b   : > { %2073 = vsyncadd (%p2254_p4), %s333_s17, 4294965248  ;;  %s2713_s16 = sand.u32 1, %s2243_s12   ;;  %s343_s21 = sand.u32 1, %s2096_s25  }
  0x6c   : > { %s342_s13 = scalar_lea.sflag [#allocation6], %s2713_s16  ;;  %s2379_s5 = scalar_lea.vmem [#allocation5], %s343_s21 }
  0x6d   : > { %2075 = dma.done.wait (%p2344_p9), %s342_s13, 16  }
  0x6e   : > { %2077 = vsyncadd (%p2344_p9), %s342_s13, 4294967280  ;;  %p2746_p8 = scmp.eq.s32.totalorder %s2243_s12, 0 }
  0x70   : > { %2079 = dma.done.wait (%p2746_p8), [#allocation6], 3072   ;;  %p2747_p4 = pmov %p2746_p8 }
  0x71   : > { %v2141_v0 = vmov 0   ;;  %v1834_v1 = vld [vmem:[#allocation7 + $0xac] ss:$12 sps:$4 sm:$0xff]   ;;  %v1836_v2 = vld [vmem:[#allocation7 + $0xa8] ss:$12 sps:$4 sm:$0xff]   ;;  %p397_p12 = scmp.lt.s32.totalorder %s2120_s8, 1 }
  0x72   : > { %2081 = vsyncadd (%p2747_p4), [#allocation6], 4294964224  ;;  %683 = vmatprep.mubr.bf16.mxu0 %v2141_v0  ;;  %651 = vmatprep.subr.bf16.mxu0 %v1834_v1  ;;  %v1837_v3 = vld [vmem:[#allocation7 + $0x94] ss:$12 sps:$4 sm:$0xff]   ;;  %v1839_v4 = vld [vmem:[#allocation7 + $0x90] ss:$12 sps:$4 sm:$0xff]  }
  0x73   : > { %652 = vmatpush1.bf16.msra.mxu0 %v1836_v2  ;;  %v1840_v5 = vld [vmem:[#allocation7 + $0x7c] ss:$12 sps:$4 sm:$0xff]   ;;  %s398_s14 = scalar_select %p397_p12, %s2120_s8, 1  ;;  %v1842_v6 = vld [vmem:[#allocation7 + $0x78] ss:$12 sps:$4 sm:$0xff]   ;;  %v406_v32 = vld [vmem:[%s2369_s18 + $0x10] sm:$0xff] }
  0x74   : > { %653 = vmatprep.subr.bf16.mxu0 %v1837_v3  ;;  %v1843_v7 = vld [vmem:[#allocation7 + $0x64] ss:$12 sps:$4 sm:$0xff]   ;;  %s2748_s9 = sld [smem:[#allocation27_spill]]  ;;  %v1845_v9 = vld [vmem:[#allocation7 + $0x60] ss:$12 sps:$4 sm:$0xff]   ;;  %v407_v33 = vld [vmem:[%s2369_s18 + $0x18] sm:$0xff] }
  0x75   : > { %v1855_v8 = vld [vmem:[#allocation7 + $0xb0] ss:$12 sps:$4 sm:$0xff]   ;;  %v1846_v10 = vld [vmem:[#allocation7 + $0x4c] ss:$12 sps:$4 sm:$0xff]   ;;  %v1848_v19 = vld [vmem:[#allocation7 + $0x48] ss:$12 sps:$4 sm:$0xff]  }
  0x76   : > { %1667 = vmatprep.subr.bf16.mxu1 %v1855_v8  ;;  %v1859_v11 = vld [vmem:[#allocation7 + $0x98] ss:$12 sps:$4 sm:$0xff]   ;;  %v2398_v14 = vld [vmem:[%s2379_s5] ss:$0 sm:$0xff]  ;;  %v1860_v18 = vld [vmem:[#allocation7 + $0x80] ss:$12 sps:$4 sm:$0xff]  }
  0x77   : > { %654 = vmatpush1.bf16.msra.mxu0 %v1839_v4  ;;  %v404_v12 = vld [vmem:[%s2369_s18] sm:$0xff]  ;;  %1668 = vmatpush3.bf16.msra.mxu1 %v1855_v8  ;;  %v405_v13 = vld [vmem:[%s2369_s18 + $0x8] sm:$0xff]  ;;  %v429_v34 = vmul.f32 %v2398_v14, %v406_v32  ;;  %v430_v35 = vmul.f32 %v2398_v14, %v407_v33  ;;  %v410_v47 = vld [vmem:[%s2369_s18 + $0x30] sm:$0xff]  ;;  %s2749_s3 = sld [smem:[#allocation29_spill]]  ;;  %s2463_s6 = sshll.u32 %s2365_s4, 6 }
  0x78   : > { %655 = vmatprep.subr.bf16.mxu0 %v1840_v5  ;;  %1669 = vmatprep.subr.bf16.mxu1 %v1859_v11  ;;  %v427_v16 = vmul.f32 %v2398_v14, %v404_v12  ;;  %v428_v17 = vmul.f32 %v2398_v14, %v405_v13  ;;  %v1849_v20 = vld [vmem:[#allocation7 + $0x34] ss:$12 sps:$4 sm:$0xff]   ;;  %v1851_v25 = vld [vmem:[#allocation7 + $0x30] ss:$12 sps:$4 sm:$0xff]   ;;  %v1854_v28 = vld [vmem:[#allocation7 + $0x18] ss:$12 sps:$4 sm:$0xff]   ;;  %v433_v51 = vmul.f32 %v2398_v14, %v410_v47 }
  0x79   : > { %v1861_v24 = vld [vmem:[#allocation7 + $0x68] ss:$12 sps:$4 sm:$0xff]   ;;  %v1862_v27 = vld [vmem:[#allocation7 + $0x50] ss:$12 sps:$4 sm:$0xff]   ;;  %v1863_v30 = vld [vmem:[#allocation7 + $0x38] ss:$12 sps:$4 sm:$0xff]  }
  0x7a   : > { %s399_s22 = scalar_lea.vmem %s2748_s9, %s398_s14  ;;  %v1852_v26 = vld [vmem:[#allocation7 + $0x1c] ss:$12 sps:$4 sm:$0xff]   ;;  %v1856_v29 = vld [vmem:[#allocation7 + $0x4] ss:$12 sps:$4 sm:$0xff]   ;;  %v1858_v31 = vld [vmem:[#allocation7] ss:$12 sps:$4 sm:$0xff]  }
  0x7b   : > { %656 = vmatpush1.bf16.msra.mxu0 %v1842_v6  ;;  %v2400_v15 = vld [vmem:[%s399_s22] ss:$0 sm:$0xff]  ;;  %1670 = vmatpush3.bf16.msra.mxu1 %v1859_v11  ;;  %v1864_v36 = vld [vmem:[#allocation7 + $0x20] ss:$12 sps:$4 sm:$0xff]   ;;  %v1865_v41 = vld [vmem:[#allocation7 + $0x8] ss:$12 sps:$4 sm:$0xff]  }
  0x7c   : > { %657 = vmatprep.subr.bf16.mxu0 %v1843_v7  ;;  %v450_v21 = vadd.f32 %v2400_v15, %v427_v16  ;;  %v451_v22 = vadd.f32 %v2400_v15, %v428_v17  ;;  %1671 = vmatprep.subr.bf16.mxu1 %v1860_v18  ;;  %v408_v37 = vld [vmem:[%s2369_s18 + $0x20] sm:$0xff]  ;;  %v409_v38 = vld [vmem:[%s2369_s18 + $0x28] sm:$0xff]  ;;  %v452_v39 = vadd.f32 %v2400_v15, %v429_v34  ;;  %v411_v48 = vld [vmem:[%s2369_s18 + $0x38] sm:$0xff]  ;;  %s2470_s27 = scalar_lea.vmem [#allocation8], %s2463_s6  ;;  %s2476_s2 = scalar_lea.vmem [#allocation9], %s2463_s6 }
  0x7d   : > { %v453_v40 = vadd.f32 %v2400_v15, %v430_v35  ;;  %v431_v42 = vmul.f32 %v2398_v14, %v408_v37  ;;  %v432_v43 = vmul.f32 %v2398_v14, %v409_v38  ;;  %v412_v49 = vld [vmem:[%s2369_s18 + $0x40] sm:$0xff]  ;;  %v413_v50 = vld [vmem:[%s2369_s18 + $0x48] sm:$0xff]  ;;  %v434_v52 = vmul.f32 %v2398_v14, %v411_v48  ;;  %v414_v60 = vld [vmem:[%s2369_s18 + $0x50] sm:$0xff]  ;;  %s2490_s30 = scalar_lea.vmem [#allocation11], %s2463_s6  ;;  %s2750_s17 = sld [smem:[#allocation18_spill]] }
  0x7e   : > { %v466_v23 = vpack.c.bf16 %v451_v22, %v450_v21  ;;  %v435_v54 = vmul.f32 %v2398_v14, %v412_v49  ;;  %v436_v55 = vmul.f32 %v2398_v14, %v413_v50  ;;  %v456_v56 = vadd.f32 %v2400_v15, %v433_v51  ;;  %v415_v61 = vld [vmem:[%s2369_s18 + $0x58] sm:$0xff]  ;;  %v416_v62 = vld [vmem:[%s2369_s18 + $0x60] sm:$0xff]  ;;  %v417_v63 = vld [vmem:[%s2369_s18 + $0x68] sm:$0xff]  ;;  %s1452_s21 = sshll.u32 %s2120_s8, 5  ;;  %s1127_s13 = sshll.u32 %s2470_s27, 4  ;;  %s2546_s13 = int_to_ptr.vmem [resolvable:$true] %s1127_s13 }
  0x7f   : > { %658 = vmatpush1.bf16.msra.mxu0 %v1845_v9  ;;  %1672 = vmatpush3.bf16.msra.mxu1 %v1860_v18  ;;  %v467_v44 = vpack.c.bf16 %v453_v40, %v452_v39  ;;  %v454_v45 = vadd.f32 %v2400_v15, %v431_v42  ;;  %v455_v46 = vadd.f32 %v2400_v15, %v432_v43  ;;  %v418_v7 = vld [vmem:[%s2369_s18 + $0x70] sm:$0xff]  ;;  %v419_v8 = vld [vmem:[%s2369_s18 + $0x78] sm:$0xff]  ;;  %s1145_s14 = sshll.u32 %s2476_s2, 4  ;;  %s1163_s20 = sshll.u32 %s2490_s30, 4  ;;  %s2548_s14 = int_to_ptr.vmem [resolvable:$true] %s1145_s14  ;;  %s2560_s20 = int_to_ptr.vmem [resolvable:$true] %s1163_s20 }
  0x80   : > { %659 = vmatprep.subr.bf16.mxu0 %v1846_v10  ;;  %1683 = vmatprep.mubr.bf16.mxu1 %v466_v23  ;;  %v457_v57 = vadd.f32 %v2400_v15, %v434_v52  ;;  %v458_v58 = vadd.f32 %v2400_v15, %v435_v54  ;;  %v459_v59 = vadd.f32 %v2400_v15, %v436_v55  ;;  %s2751_s19 = sld [smem:[#allocation23_spill]]  ;;  %s1102_s1 = scalar_lea.sflag [#allocation4], %s2365_s4 }
  0x81   : > { %1673 = vmatprep.subr.bf16.mxu1 %v1861_v24  ;;  %v468_v53 = vpack.c.bf16 %v455_v46, %v454_v45  ;;  %v437_v2 = vmul.f32 %v2398_v14, %v414_v60  ;;  %v438_v3 = vmul.f32 %v2398_v14, %v415_v61  ;;  %v439_v5 = vmul.f32 %v2398_v14, %v416_v62  ;;  %s2752_s24 = sld [smem:[#allocation30_spill]]  ;;  %s1948_s10 = scalar_lea.vmem %s2546_s13, 1024 }
  0x82   : > { %v469_v1 = vpack.c.bf16 %v457_v57, %v456_v56  ;;  %v470_v4 = vpack.c.bf16 %v459_v59, %v458_v58  ;;  %v440_v6 = vmul.f32 %v2398_v14, %v417_v63  ;;  %v441_v13 = vmul.f32 %v2398_v14, %v418_v7  ;;  %s2755_s16 = sld [smem:[#allocation32_spill]]  ;;  %p1949_p13 = scmp.ne.s32.totalorder %s2546_s13, %s1948_s10 }
  0x83   : > { %660 = vmatpush1.bf16.msra.mxu0 %v1848_v19  ;;  %1674 = vmatpush3.bf16.msra.mxu1 %v1861_v24  ;;  %v460_v9 = vadd.f32 %v2400_v15, %v437_v2  ;;  %v461_v10 = vadd.f32 %v2400_v15, %v438_v3  ;;  %v462_v11 = vadd.f32 %v2400_v15, %v439_v5  ;;  %s1451_s18 = sshll.u32 %s2750_s17, 4  ;;  %s2754_s17 = sld [smem:[#allocation31_spill]] }
  0x84   : > { %661 = vmatprep.subr.bf16.mxu0 %v1849_v20  ;;  %1675 = vmatprep.subr.bf16.mxu1 %v1862_v27  ;;  %v463_v12 = vadd.f32 %v2400_v15, %v440_v6  ;;  %v442_v16 = vmul.f32 %v2398_v14, %v419_v8  ;;  %v464_v19 = vadd.f32 %v2400_v15, %v441_v13  ;;  %v508_v14 = vlaneseq  ;;  %s1124_s5 = sadd.s32 %s1452_s21, %s1451_s18  ;;  %s2142_s9 = smov [#allocation8]  }
  0x85   : > { %v471_v17 = vpack.c.bf16 %v461_v10, %v460_v9  ;;  %s1453_s8 = sshll.u32 %s1124_s5, 6  ;;  %s1952_s22 = sshll.u32 %s2142_s9, 4  ;;  %s1953_s22 = int_to_ptr.vmem [resolvable:$false] %s1952_s22 }
  0x86   : > { %v472_v18 = vpack.c.bf16 %v463_v12, %v462_v11  ;;  %v465_v20 = vadd.f32 %v2400_v15, %v442_v16  ;;  %v509_v22 = vshrl.u32 %v508_v14, 7  ;;  %v506_v15 = vld [vmem:[%s2749_s3] sm:$0x7]  ;;  %p2756_p2 = scmp.ne.s32.totalorder %s2751_s19, 0  ;;  %p1955_p11 = scmp.lt.s32.totalorder %s2546_s13, %s1953_s22 }
  0x87   : > { %662 = vmatpush1.bf16.msra.mxu0 %v1851_v25  ;;  %1676 = vmatpush3.bf16.msra.mxu1 %v1862_v27  ;;  %s2753_s23 = smov %s2752_s24  ;;  %s2558_s3 = scalar_lea.hbm %s2752_s24, %s1453_s8 }
  0x88   : > { %663 = vmatprep.subr.bf16.mxu0 %v1852_v26  ;;  %1677 = vmatprep.subr.bf16.mxu1 %v1863_v30  ;;  %v473_v21 = vpack.c.bf16 %v465_v20, %v464_v19  ;;  %v514_v24 = vsub.s32 1, %v509_v22  ;;  %s2571_s0 = scalar_lea.hbm %s2755_s16, %s1453_s8  ;;  %p1950_p9 = pnand %p1949_p13, %p2756_p2 }
  0x89   : > { %s2566_s18 = scalar_lea.hbm %s2754_s17, %s1453_s8 }
  0x8a   : > { %p1951_p5 = pneg %p1950_p9 }
  0x8b   : > { %664 = vmatpush1.bf16.msra.mxu0 %v1854_v28  ;;  %1678 = vmatpush3.bf16.msra.mxu1 %v1863_v30  ;;  %v2460_v28 = vrot.slane %v506_v15, %v514_v24 }
  0x8c   : > { %665 = vmatprep.subr.bf16.mxu0 %v1856_v29  ;;  %1679 = vmatprep.subr.bf16.mxu1 %v1864_v36 }
  0x8f   : > { %666 = vmatpush1.bf16.msra.mxu0 %v1858_v31  ;;  %1680 = vmatpush3.bf16.msra.mxu1 %v1864_v36  ;;  %v518_v31 = vsub.s32 2, %v509_v22 }
  0x90   : > { %1681 = vmatprep.subr.bf16.mxu1 %v1865_v41 }
  0x91   : > { %v2473_v38 = vrot.slane %v506_v15, %v518_v31 }
  0x92   : > { %684 = vmatmul.mubr.bf16.vlgmr.msra.gmra.mxu0 %v466_v23  ;;  %v510_v23 = vsub.s32 0, %v509_v22 }
  0x93   : > { %693 = vmatprep.mubr.bf16.mxu0 %v2141_v0  ;;  %1682 = vmatpush3.bf16.msra.mxu1 %v1865_v41 }
  0x94   : > { %v2458_v26 = vrot.slane %v506_v15, %v510_v23 }
  0x96   : > { %1684 = vmatmul.mubr.bf16.vlgmr.msra.gmra.mxu1 %v467_v44 }
  0x97   : > { %1687 = vmatprep.mubr.bf16.mxu1 %v468_v53 }
  0x9a   : > { %694 = vmatmul.mubr.bf16.gmra.mxu0 %v467_v44 }
  0x9b   : > { %703 = vmatprep.mubr.bf16.mxu0 %v2141_v0 }
  0x9e   : > { %1688 = vmatmul.mubr.bf16.gmra.mxu1 %v469_v1 }
  0x9f   : > { %1691 = vmatprep.mubr.bf16.mxu1 %v470_v4 }
  0xa2   : > { %704 = vmatmul.mubr.bf16.gmra.mxu0 %v468_v53 }
  0xa3   : > { %713 = vmatprep.mubr.bf16.mxu0 %v2141_v0 }
  0xa6   : > { %1692 = vmatmul.mubr.bf16.gmra.mxu1 %v471_v17 }
  0xa7   : > { %1695 = vmatprep.mubr.bf16.mxu1 %v472_v18 }
  0xaa   : > { %714 = vmatmul.mubr.bf16.gmra.mxu0 %v469_v1 }
  0xab   : > { %723 = vmatprep.mubr.bf16.mxu0 %v2141_v0 }
  0xae   : > { %1696 = vmatmul.mubr.bf16.gmra.mxu1 %v473_v21 }
  0xb2   : > { %724 = vmatmul.mubr.bf16.gmra.mxu0 %v470_v4 }
  0xb3   : > { %733 = vmatprep.mubr.bf16.mxu0 %v2141_v0 }
  0xba   : > { %734 = vmatmul.mubr.bf16.gmra.mxu0 %v471_v17 }
  0xbb   : > { %743 = vmatprep.mubr.bf16.mxu0 %v2141_v0 }
  0xc2   : > { %744 = vmatmul.mubr.bf16.gmra.mxu0 %v472_v18 }
  0xc3   : > { %753 = vmatprep.mubr.bf16.mxu0 %v2141_v0 }
  0xca   : > { %754 = vmatmul.mubr.bf16.gmra.mxu0 %v473_v21 }
 0x152   : > { %v685_v25 = vpop.f32.mrf.mxu0 }
 0x153   : > { %v686_v29 = vadd.f32 %v685_v25, %v2458_v26 }
 0x154   : > { %v687_v27 = vpop.f32.mrf.mxu0 }
 0x155   : > { %v688_v33 = vadd.f32 %v687_v27, %v2460_v28 }
 0x156   : > { %v689_v0 = vpop.f32.mrf.mxu0  ;;  %v1685_v40 = vpop.f32.mrf.mxu1 }
 0x157   : > { %v690_v30 = vadd.f32 %v689_v0, %v2458_v26  ;;  %v807_v45 = vadd.f32 %v1685_v40, %v2473_v38 }
 0x158   : > { %v691_v32 = vpop.f32.mrf.mxu0  ;;  %v798_v42 = vpop.f32.mrf.mxu1 }
 0x159   : > { %v1513_v34 = vpack.c.bf16 %v690_v30, %v686_v29  ;;  %v692_v35 = vadd.f32 %v691_v32, %v2460_v28  ;;  %v799_v51 = vadd.f32 %v798_v42, %v2473_v38 }
 0x15a   : > { %v695_v36 = vpop.f32.mrf.mxu0  ;;  %v1686_v48 = vpop.f32.mrf.mxu1 }
 0x15b   : > { %1514 = vst [vmem:[%s2470_s27] sm:$0xff] %v1513_v34   ;;  %v1553_v37 = vpack.c.bf16 %v692_v35, %v688_v33  ;;  %v696_v43 = vadd.f32 %v695_v36, %v2458_v26  ;;  %v810_v52 = vadd.f32 %v1686_v48, %v2473_v38 }
 0x15c   : > { %v697_v39 = vpop.f32.mrf.mxu0  ;;  %v801_v54 = vpop.f32.mrf.mxu1 }
 0x15d   : > { %1554 = vst [vmem:[%s2476_s2] sm:$0xff] %v1553_v37   ;;  %v698_v46 = vadd.f32 %v697_v39, %v2460_v28  ;;  %v1598_v56 = vpack.c.bf16 %v810_v52, %v807_v45  ;;  %v802_v57 = vadd.f32 %v801_v54, %v2473_v38 }
 0x15e   : > { %v699_v41 = vpop.f32.mrf.mxu0  ;;  %v1689_v59 = vpop.f32.mrf.mxu1 }
 0x15f   : > { %v700_v44 = vadd.f32 %v699_v41, %v2458_v26  ;;  %1644 = vst [vmem:[%s2490_s30 + $0x8] sm:$0xff] %v1598_v56   ;;  %v1593_v60 = vpack.c.bf16 %v802_v57, %v799_v51  ;;  %v823_v2 = vadd.f32 %v1689_v59, %v2473_v38 }
 0x160   : > { %v701_v47 = vpop.f32.mrf.mxu0  ;;  %v814_v62 = vpop.f32.mrf.mxu1 }
 0x161   : > { %v1518_v49 = vpack.c.bf16 %v700_v44, %v696_v43  ;;  %v702_v50 = vadd.f32 %v701_v47, %v2460_v28  ;;  %1594 = vst [vmem:[%s2490_s30] sm:$0xff] %v1593_v60   ;;  %v815_v8 = vadd.f32 %v814_v62, %v2473_v38 }
 0x162   : > { %v705_v53 = vpop.f32.mrf.mxu0  ;;  %v1690_v5 = vpop.f32.mrf.mxu1 }
 0x163   : > { %1630 = vst [vmem:[%s2470_s27 + $0x8] sm:$0xff] %v1518_v49   ;;  %v1558_v55 = vpack.c.bf16 %v702_v50, %v698_v46  ;;  %v706_v63 = vadd.f32 %v705_v53, %v2458_v26  ;;  %v826_v9 = vadd.f32 %v1690_v5, %v2473_v38 }
 0x164   : > { %v707_v58 = vpop.f32.mrf.mxu0  ;;  %v817_v11 = vpop.f32.mrf.mxu1 }
 0x165   : > { %1637 = vst [vmem:[%s2476_s2 + $0x8] sm:$0xff] %v1558_v55   ;;  %v708_v3 = vadd.f32 %v707_v58, %v2460_v28  ;;  %v1608_v13 = vpack.c.bf16 %v826_v9, %v823_v2  ;;  %v818_v16 = vadd.f32 %v817_v11, %v2473_v38 }
 0x166   : > { %v709_v61 = vpop.f32.mrf.mxu0  ;;  %v1693_v18 = vpop.f32.mrf.mxu1 }
 0x167   : > { %v710_v1 = vadd.f32 %v709_v61, %v2458_v26  ;;  %1646 = vst [vmem:[%s2490_s30 + $0x18] sm:$0xff] %v1608_v13   ;;  %v1603_v19 = vpack.c.bf16 %v818_v16, %v815_v8  ;;  %v839_v23 = vadd.f32 %v1693_v18, %v2473_v38 }
 0x168   : > { %v711_v4 = vpop.f32.mrf.mxu0  ;;  %v830_v21 = vpop.f32.mrf.mxu1 }
 0x169   : > { %v1523_v6 = vpack.c.bf16 %v710_v1, %v706_v63  ;;  %v712_v7 = vadd.f32 %v711_v4, %v2460_v28  ;;  %1645 = vst [vmem:[%s2490_s30 + $0x10] sm:$0xff] %v1603_v19   ;;  %v831_v29 = vadd.f32 %v830_v21, %v2473_v38 }
 0x16a   : > { %v715_v10 = vpop.f32.mrf.mxu0  ;;  %v1694_v25 = vpop.f32.mrf.mxu1 }
 0x16b   : > { %1631 = vst [vmem:[%s2470_s27 + $0x10] sm:$0xff] %v1523_v6   ;;  %v1563_v12 = vpack.c.bf16 %v712_v7, %v708_v3  ;;  %v716_v14 = vadd.f32 %v715_v10, %v2458_v26  ;;  %v842_v30 = vadd.f32 %v1694_v25, %v2473_v38 }
 0x16c   : > { %v717_v17 = vpop.f32.mrf.mxu0  ;;  %v833_v32 = vpop.f32.mrf.mxu1 }
 0x16d   : > { %1638 = vst [vmem:[%s2476_s2 + $0x10] sm:$0xff] %v1563_v12   ;;  %v718_v15 = vadd.f32 %v717_v17, %v2460_v28  ;;  %v1618_v34 = vpack.c.bf16 %v842_v30, %v839_v23  ;;  %v834_v35 = vadd.f32 %v833_v32, %v2473_v38 }
 0x16e   : > { %v719_v20 = vpop.f32.mrf.mxu0  ;;  %v1697_v37 = vpop.f32.mrf.mxu1 }
 0x16f   : > { %v720_v22 = vadd.f32 %v719_v20, %v2458_v26  ;;  %1648 = vst [vmem:[%s2490_s30 + $0x28] sm:$0xff] %v1618_v34   ;;  %v1613_v39 = vpack.c.bf16 %v834_v35, %v831_v29  ;;  %v855_v44 = vadd.f32 %v1697_v37, %v2473_v38 }
 0x170   : > { %v721_v24 = vpop.f32.mrf.mxu0  ;;  %v846_v41 = vpop.f32.mrf.mxu1 }
 0x171   : > { %v1528_v27 = vpack.c.bf16 %v720_v22, %v716_v14  ;;  %v722_v0 = vadd.f32 %v721_v24, %v2460_v28  ;;  %1647 = vst [vmem:[%s2490_s30 + $0x20] sm:$0xff] %v1613_v39   ;;  %v847_v50 = vadd.f32 %v846_v41, %v2473_v38 }
 0x172   : > { %v725_v31 = vpop.f32.mrf.mxu0  ;;  %v1698_v47 = vpop.f32.mrf.mxu1 }
 0x173   : > { %1632 = vst [vmem:[%s2470_s27 + $0x18] sm:$0xff] %v1528_v27   ;;  %v1568_v33 = vpack.c.bf16 %v722_v0, %v718_v15  ;;  %v726_v42 = vadd.f32 %v725_v31, %v2458_v26  ;;  %v858_v51 = vadd.f32 %v1698_v47, %v2473_v38 }
 0x174   : > { %v727_v36 = vpop.f32.mrf.mxu0  ;;  %v849_v53 = vpop.f32.mrf.mxu1 }
 0x175   : > { %1639 = vst [vmem:[%s2476_s2 + $0x18] sm:$0xff] %v1568_v33   ;;  %v728_v45 = vadd.f32 %v727_v36, %v2460_v28  ;;  %v1628_v55 = vpack.c.bf16 %v858_v51, %v855_v44  ;;  %v850_v56 = vadd.f32 %v849_v53, %v2473_v38 }
 0x176   : > { %v729_v40 = vpop.f32.mrf.mxu0 }
 0x177   : > { %v730_v43 = vadd.f32 %v729_v40, %v2458_v26  ;;  %1650 = vst [vmem:[%s2490_s30 + $0x38] sm:$0xff] %v1628_v55   ;;  %v1623_v58 = vpack.c.bf16 %v850_v56, %v847_v50 }
 0x178   : > { %v731_v46 = vpop.f32.mrf.mxu0 }
 0x179   : > { %v1533_v48 = vpack.c.bf16 %v730_v43, %v726_v42  ;;  %v732_v49 = vadd.f32 %v731_v46, %v2460_v28  ;;  %1649 = vst [vmem:[%s2490_s30 + $0x30] sm:$0xff] %v1623_v58  }
 0x17a   : > { %v735_v52 = vpop.f32.mrf.mxu0 }
 0x17b   : > { %1633 = vst [vmem:[%s2470_s27 + $0x20] sm:$0xff] %v1533_v48   ;;  %v1573_v54 = vpack.c.bf16 %v732_v49, %v728_v45  ;;  %v736_v60 = vadd.f32 %v735_v52, %v2458_v26 }
 0x17c   : > { %v737_v57 = vpop.f32.mrf.mxu0 }
 0x17d   : > { %1640 = vst [vmem:[%s2476_s2 + $0x20] sm:$0xff] %v1573_v54   ;;  %v738_v63 = vadd.f32 %v737_v57, %v2460_v28 }
 0x17e   : > { %v739_v59 = vpop.f32.mrf.mxu0 }
 0x17f   : > { %v740_v61 = vadd.f32 %v739_v59, %v2458_v26 }
 0x180   : > { %v741_v62 = vpop.f32.mrf.mxu0 }
 0x181   : > { %v1538_v1 = vpack.c.bf16 %v740_v61, %v736_v60  ;;  %v742_v2 = vadd.f32 %v741_v62, %v2460_v28 }
 0x182   : > { %v745_v38 = vpop.f32.mrf.mxu0 }
 0x183   : > { %1634 = vst [vmem:[%s2470_s27 + $0x28] sm:$0xff] %v1538_v1   ;;  %v1578_v3 = vpack.c.bf16 %v742_v2, %v738_v63  ;;  %v746_v6 = vadd.f32 %v745_v38, %v2458_v26 }
 0x184   : > { %v747_v4 = vpop.f32.mrf.mxu0 }
 0x185   : > { %1641 = vst [vmem:[%s2476_s2 + $0x28] sm:$0xff] %v1578_v3   ;;  %v748_v9 = vadd.f32 %v747_v4, %v2460_v28 }
 0x186   : > { %v749_v5 = vpop.f32.mrf.mxu0 }
 0x187   : > { %v750_v7 = vadd.f32 %v749_v5, %v2458_v26 }
 0x188   : > { %v751_v8 = vpop.f32.mrf.mxu0 }
 0x189   : > { %v1543_v10 = vpack.c.bf16 %v750_v7, %v746_v6  ;;  %v752_v11 = vadd.f32 %v751_v8, %v2460_v28 }
 0x18a   : > { %v755_v12 = vpop.f32.mrf.mxu0 }
 0x18b   : > { %1635 = vst [vmem:[%s2470_s27 + $0x30] sm:$0xff] %v1543_v10   ;;  %v1583_v13 = vpack.c.bf16 %v752_v11, %v748_v9  ;;  %v756_v18 = vadd.f32 %v755_v12, %v2458_v26 }
 0x18c   : > { %v757_v16 = vpop.f32.mrf.mxu0 }
 0x18d   : > { %1642 = vst [vmem:[%s2476_s2 + $0x30] sm:$0xff] %v1583_v13   ;;  %v758_v21 = vadd.f32 %v757_v16, %v2460_v28 }
 0x18e   : > { %v759_v17 = vpop.f32.mrf.mxu0 }
 0x18f   : > { %v760_v19 = vadd.f32 %v759_v17, %v2458_v26 }
 0x190   : > { %v761_v20 = vpop.f32.mrf.mxu0 }
 0x191   : > { %v1548_v14 = vpack.c.bf16 %v760_v19, %v756_v18  ;;  %v762_v22 = vadd.f32 %v761_v20, %v2460_v28 }
 0x193   : > { %1636 = vst [vmem:[%s2470_s27 + $0x38] sm:$0xff] %v1548_v14   ;;  %v1588_v23 = vpack.c.bf16 %v762_v22, %v758_v21  ;;  %s1954_s27 = scalar_lea.vmem %s1953_s22, 2048 }
 0x194   : > { %p1956_p3 = scmp.lt.s32.totalorder %s1954_s27, %s1948_s10 }
 0x196   : > { %p1957_p1 = por %p1956_p3, %p1955_p11 }
 0x198   : > { %p1958_p7 = pnand %p1957_p1, %p1951_p5 }
 0x19a   : > { %1961 = shalt.err (!%p1958_p7)
}
 0x19b   : > { %s1962_s8 = scalar_lea.hbm %s2558_s3, 1024  ;;  %s1966_s30 = scalar_lea.hbm %s2753_s23, 4096 }
 0x19c   : > { %p1963_p10 = scmp.ne.s32.totalorder %s2558_s3, %s1962_s8  ;;  %p1967_p8 = scmp.lt.s32.totalorder %s2558_s3, %s2753_s23 }
 0x19d   : > { %p1968_p4 = scmp.lt.s32.totalorder %s1966_s30, %s1962_s8 }
 0x19e   : > { %p1964_p0 = pnand %p1963_p10, %p2756_p2 }
 0x19f   : > { %p1969_p12 = por %p1968_p4, %p1967_p8 }
 0x1a0   : > { %p1965_p6 = pneg %p1964_p0 }
 0x1a2   : > { %p1970_p13 = pnand %p1969_p12, %p1965_p6 }
 0x1a4   : > { %1973 = shalt.err (!%p1970_p13)
}
 0x1a5   : > { %s2143_s10 = smov 64   ;;  %s2144_s9 = smov 4   ;;  %1643 = vst [vmem:[%s2476_s2 + $0x38] sm:$0xff] %v1588_v23  }
 0x1a6   : > { %1707 = dma.vmem_to_hbm [thread:$0]  (%p2756_p2), %s2546_s13, 1024, %s2558_s3, %s1102_s1, %s2143_s10, %s2143_s10, %s2144_s9  }
 0x1a7   : > { %s2757_s22 = sand.u32 1, %s2243_s12   ;;  %s1974_s8 = scalar_lea.vmem %s2548_s14, 1024 }
 0x1a8   : > { %s2602_s27 = scalar_lea.sflag [#allocation10], %s2757_s22  ;;  %p1975_p9 = scmp.ne.s32.totalorder %s2548_s14, %s1974_s8 }
 0x1a9   : > { %s2145_s24 = smov [#allocation9]  }
 0x1aa   : > { %p1976_p5 = pnand %p1975_p9, %p2756_p2  ;;  %s1978_s6 = sshll.u32 %s2145_s24, 4  ;;  %s1979_s6 = int_to_ptr.vmem [resolvable:$false] %s1978_s6 }
 0x1ab   : > { %s1980_s30 = scalar_lea.vmem %s1979_s6, 2048  ;;  %p1981_p3 = scmp.lt.s32.totalorder %s2548_s14, %s1979_s6 }
 0x1ac   : > { %p1977_p11 = pneg %p1976_p5  ;;  %p1982_p1 = scmp.lt.s32.totalorder %s1980_s30, %s1974_s8 }
 0x1ae   : > { %p1983_p7 = por %p1982_p1, %p1981_p3 }
 0x1b0   : > { %p1984_p10 = pnand %p1983_p7, %p1977_p11 }
 0x1b2   : > { %1987 = shalt.err (!%p1984_p10)
}
 0x1b3   : > { %s1988_s1 = scalar_lea.hbm %s2566_s18, 1024  ;;  %s1992_s2 = scalar_lea.hbm %s2754_s17, 4096 }
 0x1b4   : > { %p1989_p0 = scmp.ne.s32.totalorder %s2566_s18, %s1988_s1  ;;  %p1993_p4 = scmp.lt.s32.totalorder %s2566_s18, %s2754_s17 }
 0x1b5   : > { %p1994_p12 = scmp.lt.s32.totalorder %s1992_s2, %s1988_s1 }
 0x1b6   : > { %p1990_p6 = pnand %p1989_p0, %p2756_p2 }
 0x1b7   : > { %p1995_p13 = por %p1994_p12, %p1993_p4 }
 0x1b8   : > { %p1991_p8 = pneg %p1990_p6 }
 0x1ba   : > { %p1996_p9 = pnand %p1995_p13, %p1991_p8 }
 0x1bc   : > { %1999 = shalt.err (!%p1996_p9)
}
 0x1bd   : > { %1708 = dma.vmem_to_hbm [thread:$0]  (%p2756_p2), %s2548_s14, 1024, %s2566_s18, %s2602_s27, %s2143_s10, %s2143_s10, %s2144_s9  }
 0x1be   : > { %s2000_s21 = scalar_lea.vmem %s2560_s20, 1024  ;;  %s2146_s5 = smov [#allocation11]  }
 0x1bf   : > { %p2001_p5 = scmp.ne.s32.totalorder %s2560_s20, %s2000_s21  ;;  %s2004_s22 = sshll.u32 %s2146_s5, 4  ;;  %s2005_s22 = int_to_ptr.vmem [resolvable:$false] %s2004_s22 }
 0x1c0   : > { %s2006_s8 = scalar_lea.vmem %s2005_s22, 2048  ;;  %p2007_p1 = scmp.lt.s32.totalorder %s2560_s20, %s2005_s22 }
 0x1c1   : > { %p2002_p11 = pnand %p2001_p5, %p2756_p2  ;;  %p2008_p7 = scmp.lt.s32.totalorder %s2006_s8, %s2000_s21 }
 0x1c3   : > { %p2003_p3 = pneg %p2002_p11  ;;  %p2009_p10 = por %p2008_p7, %p2007_p1 }
 0x1c5   : > { %p2010_p0 = pnand %p2009_p10, %p2003_p3 }
 0x1c7   : > { %2013 = shalt.err (!%p2010_p0)
}
 0x1c8   : > { %s2014_s24 = scalar_lea.hbm %s2571_s0, 1024  ;;  %s2018_s6 = scalar_lea.hbm %s2755_s16, 4096 }
 0x1c9   : > { %p2015_p6 = scmp.ne.s32.totalorder %s2571_s0, %s2014_s24  ;;  %p2019_p12 = scmp.lt.s32.totalorder %s2571_s0, %s2755_s16 }
 0x1ca   : > { %p2020_p13 = scmp.lt.s32.totalorder %s2018_s6, %s2014_s24 }
 0x1cb   : > { %p2016_p8 = pnand %p2015_p6, %p2756_p2 }
 0x1cc   : > { %p2021_p9 = por %p2020_p13, %p2019_p12 }
 0x1cd   : > { %p2017_p4 = pneg %p2016_p8 }
 0x1cf   : > { %p2022_p5 = pnand %p2021_p9, %p2017_p4 }
 0x1d1   : > { %2025 = shalt.err (!%p2022_p5)
}
 0x1d2   : > { %1709 = dma.vmem_to_hbm [thread:$0]  (%p2756_p2), %s2560_s20, 1024, %s2571_s0, %s2602_s27, %s2143_s10, %s2143_s10, %s2144_s9  }
 0x1d3 PF: > { %s2758_s12 = sld [smem:[#allocation17_spill]]  ;;  %p1737_p11 = scmp.ge.s32.totalorder %s2132_s11, 2 }
 0x1d4   : > { %s2759_s4 = sld [smem:[#allocation21_spill]] }
 0x1d9   : > { %s1178_s2 = sand.u32 1, %s2758_s12  }
 0x1da   : > { %p2760_p3 = scmp.ne.s32.totalorder %s2759_s4, 0  ;;  %s1179_s13 = scalar_lea.sflag [#allocation4], %s1178_s2 }
 0x1dc   : > { %p1725_p1 = pnand %p1737_p11, %p2760_p3 }
 0x1de   : > { %p1726_p7 = pneg %p1725_p1 }
 0x1e0   : > { %2083 = dma.done.wait (%p1726_p7), %s1179_s13, 1024  }
 0x1e1   : > { %2085 = vsyncadd (%p1726_p7), %s1179_s13, 4294966272  ;;  %s2761_s19 = sadd.s32 4294967294, %s2132_s11  }
 0x1e2   : > { %s1187_s3 = sand.u32 1, %s2761_s19  }
 0x1e3   : > { %s1188_s21 = scalar_lea.sflag [#allocation10], %s1187_s3 }
 0x1e4   : > { %2087 = dma.done.wait (%p1726_p7), %s1188_s21, 2048  }
 0x1e5   : > { %2089 = vsyncadd (%p1726_p7), %s1188_s21, 4294965248  ;;  %s30_s11 = sadd.s32 1, %s2132_s11   ;;  %s2762_s30 = sld [smem:[#allocation19_spill]] }
 0x1e6   : > { %p27_p2 = scmp.ge.s32.totalorder %s30_s11, 6   ;;  %s2763_s8 = sld [smem:[#allocation20_spill]] }
 0x1e7   : > { %s2764_s9 = sld [smem:[#allocation22_spill]]  ;;  %s2766_s24 = smov %s2096_s25 }
 0x1e8   : > { %s2765_s10 = sld [smem:[#allocation24_spill]]  ;;  %s2767_s25 = smov %s2100_s26 }
 0x1e9   : > { %s2768_s26 = smov %s2332_s15  ;;  %s2769_s27 = smov %s2108_s28 }
 0x1ea   : > { %s2770_s28 = smov %s2112_s29  ;;  %s2771_s29 = smov %s2311_s7 }
 0x1eb   :  { %29 = sbr.rel (!%p27_p2) target bundleno = 22 (0x16), region = 137 }
 0x1f0   :  { %1202 = vsyncpa [#allocation3], 1 }
 0x1f1   :  { %1204 = vsyncpa [#allocation3 + $0x1], 1 }
 0x1f2   :  { %1205 = vsyncpa [#allocation6], 1 }
 0x1f3   :  { %1207 = vsyncpa [#allocation6 + $0x1], 1 }
 0x1f4   :  { %1208 = vsyncpa [#allocation4], 1 }
 0x1f5   :  { %1210 = vsyncpa [#allocation4 + $0x1], 1 }
 0x1f6   :  { %1211 = vsyncpa [#allocation10], 1 }
 0x1f7   :  { %1213 = vsyncpa [#allocation10 + $0x1], 1 }

</bundles_post_ra>
